<compile_context>
chip_gen: v7x
topology: tpu7x:2x2x1
jax: 0.10.0
libtpu: 0.0.40
codegen_flags: <defaults>
</compile_context>

<pallas_src>
import math
import numpy as np

import jax
import jax.numpy as jnp
from jax.experimental import pallas as pl
from jax.experimental.pallas import tpu as pltpu


def _round_up(x, m):
    return ((x + m - 1) // m) * m


# -----------------------------------------------------------------------------
# Pallas kernel 1: per-pixel Linear (used for each SegformerMLP in linear_c)
#   (P, Cin) @ (Cin, Cout) + bias -> (P, Cout), row-tiled over the grid.
# -----------------------------------------------------------------------------
def _linear_kernel(x_ref, w_ref, b_ref, o_ref):
    o_ref[...] = (
        jnp.dot(x_ref[...], w_ref[...], preferred_element_type=jnp.float32)
        + b_ref[...]
    )


def pallas_linear(x, w, b, tm=512):
    P, Cin = x.shape
    Cin_w, Cout = w.shape
    assert Cin == Cin_w

    # Lane-align both channel axes to 128: dense vld / unmasked vst and full
    # MXU tiles.  Zero padding is mathematically inert and sliced off below.
    Cin_pad = _round_up(Cin, 128)
    Cout_pad = _round_up(Cout, 128)
    if Cin_pad != Cin:
        x = jnp.pad(x, ((0, 0), (0, Cin_pad - Cin)))
        w = jnp.pad(w, ((0, Cin_pad - Cin), (0, 0)))
    if Cout_pad != Cout:
        w = jnp.pad(w, ((0, 0), (0, Cout_pad - Cout)))
        b = jnp.pad(b, (0, Cout_pad - Cout))

    # Row tile: big (512) at real sizes, shrunk + padded for tiny inputs.
    tm = min(tm, _round_up(P, 8))
    P_pad = _round_up(P, tm)
    if P_pad != P:
        x = jnp.pad(x, ((0, P_pad - P), (0, 0)))

    # bf16 operands (f32 accumulation on the MXU) -> half the HBM traffic.
    x_bf = x.astype(jnp.bfloat16)
    w_bf = w.astype(jnp.bfloat16)

    out = pl.pallas_call(
        _linear_kernel,
        out_shape=jax.ShapeDtypeStruct((P_pad, Cout_pad), jnp.float32),
        grid=(P_pad // tm,),
        in_specs=[
            pl.BlockSpec((tm, Cin_pad), lambda i: (i, 0)),
            pl.BlockSpec((Cin_pad, Cout_pad), lambda i: (0, 0)),
            pl.BlockSpec((1, Cout_pad), lambda i: (0, 0)),
        ],
        out_specs=pl.BlockSpec((tm, Cout_pad), lambda i: (i, 0)),
        compiler_params=pltpu.CompilerParams(
            dimension_semantics=("parallel",),  # row axis shards across TCs
        ),
        cost_estimate=pl.CostEstimate(
            flops=2 * P_pad * Cin_pad * Cout_pad,
            transcendentals=0,
            bytes_accessed=(P_pad * Cin_pad * 2 + Cin_pad * Cout_pad * 2
                            + P_pad * Cout_pad * 4),
        ),
    )(x_bf, w_bf, b.reshape(1, Cout_pad).astype(jnp.float32))

    if P_pad != P or Cout_pad != Cout:
        out = out[:P, :Cout]
    return out


# -----------------------------------------------------------------------------
# Pallas kernel 2: fused decode head
#   logits = (relu((x @ W_fuse) * bn_scale + bn_shift)) @ W_cls + b_cls
# (linear_fuse 1x1 conv, folded eval-mode BatchNorm2d, ReLU, dropout=identity,
#  classifier 1x1 conv) -- per pixel, row-tiled over the grid.
# -----------------------------------------------------------------------------
def _fused_head_kernel(x_ref, wf_ref, scale_ref, shift_ref, wc_ref, bc_ref, o_ref):
    h = jnp.dot(x_ref[...], wf_ref[...], preferred_element_type=jnp.float32)
    h = h * scale_ref[...] + shift_ref[...]      # folded BatchNorm2d (eval mode)
    h = jnp.maximum(h, 0.0)                      # ReLU; dropout = identity (eval)
    o_ref[...] = (
        jnp.dot(h.astype(wc_ref.dtype), wc_ref[...],
                preferred_element_type=jnp.float32)
        + bc_ref[...]
    )


def pallas_fused_head(x, w_fuse, bn_scale, bn_shift, w_cls, b_cls, tm=512):
    P, K = x.shape
    Cf, Ch = w_fuse.shape
    assert K >= Cf                      # caller may pre-pad x columns with zeros
    NC = w_cls.shape[1]

    # K (linear_fuse input channels, possibly already padded by the caller).
    K_pad = _round_up(max(K, Cf), 128)
    if K_pad != K:
        x = jnp.pad(x, ((0, 0), (0, K_pad - K)))
    if K_pad != Cf:
        w_fuse = jnp.pad(w_fuse, ((0, K_pad - Cf), (0, 0)))

    # Decoder hidden width: pad to 128 so the intermediate tile and the second
    # matmul's contraction axis are lane-aligned (padding stays exactly zero:
    # zero W_fuse columns -> zero scale/shift -> relu(0)=0 -> zero W_cls rows).
    Ch_pad = _round_up(Ch, 128)
    if Ch_pad != Ch:
        w_fuse = jnp.pad(w_fuse, ((0, 0), (0, Ch_pad - Ch)))
        bn_scale = jnp.pad(bn_scale, (0, Ch_pad - Ch))
        bn_shift = jnp.pad(bn_shift, (0, Ch_pad - Ch))
        w_cls = jnp.pad(w_cls, ((0, Ch_pad - Ch), (0, 0)))

    # Classifier output: pad to 128 lanes so the output stores are unmasked.
    NC_pad = _round_up(NC, 128)
    if NC_pad != NC:
        w_cls = jnp.pad(w_cls, ((0, 0), (0, NC_pad - NC)))
        b_cls = jnp.pad(b_cls, (0, NC_pad - NC))

    # Row tile: large tile amortizes per-step overhead; pad rows if needed.
    tm = min(tm, _round_up(P, 8))
    P_pad = _round_up(P, tm)
    if P_pad != P:
        x = jnp.pad(x, ((0, P_pad - P), (0, 0)))

    x_bf = x.astype(jnp.bfloat16)
    wf_bf = w_fuse.astype(jnp.bfloat16)
    wc_bf = w_cls.astype(jnp.bfloat16)

    out = pl.pallas_call(
        _fused_head_kernel,
        out_shape=jax.ShapeDtypeStruct((P_pad, NC_pad), jnp.float32),
        grid=(P_pad // tm,),
        in_specs=[
            pl.BlockSpec((tm, K_pad), lambda i: (i, 0)),
            pl.BlockSpec((K_pad, Ch_pad), lambda i: (0, 0)),
            pl.BlockSpec((1, Ch_pad), lambda i: (0, 0)),
            pl.BlockSpec((1, Ch_pad), lambda i: (0, 0)),
            pl.BlockSpec((Ch_pad, NC_pad), lambda i: (0, 0)),
            pl.BlockSpec((1, NC_pad), lambda i: (0, 0)),
        ],
        out_specs=pl.BlockSpec((tm, NC_pad), lambda i: (i, 0)),
        compiler_params=pltpu.CompilerParams(
            dimension_semantics=("parallel",),
        ),
        cost_estimate=pl.CostEstimate(
            flops=2 * P_pad * K_pad * Ch_pad + 2 * P_pad * Ch_pad * NC_pad,
            transcendentals=0,
            bytes_accessed=(P_pad * K_pad * 2 + K_pad * Ch_pad * 2
                            + Ch_pad * NC_pad * 2 + P_pad * NC_pad * 4),
        ),
    )(
        x_bf,
        wf_bf,
        bn_scale.reshape(1, Ch_pad).astype(jnp.float32),
        bn_shift.reshape(1, Ch_pad).astype(jnp.float32),
        wc_bf,
        b_cls.reshape(1, NC_pad).astype(jnp.float32),
    )
    return out[:P, :NC]


# -----------------------------------------------------------------------------
# Glue: bilinear interpolation matching F.interpolate(mode='bilinear',
# align_corners=False), expressed as two small interpolation matrices and
# applied on NHWC tensors (channels stay on the lane axis).
# -----------------------------------------------------------------------------
def _bilinear_matrix(in_size, out_size):
    m = np.zeros((out_size, in_size), dtype=np.float32)
    scale = in_size / out_size
    for o in range(out_size):
        src = (o + 0.5) * scale - 0.5
        src = max(src, 0.0)
        i0 = min(int(math.floor(src)), in_size - 1)
        i1 = min(i0 + 1, in_size - 1)
        lam = src - i0
        m[o, i0] += 1.0 - lam
        m[o, i1] += lam
    return jnp.asarray(m)


def bilinear_resize_nhwc(x, out_h, out_w):
    _, h, w, _ = x.shape
    mh = _bilinear_matrix(h, out_h)
    mw = _bilinear_matrix(w, out_w)
    x = jnp.einsum("oh,bhwc->bowc", mh, x)
    x = jnp.einsum("pw,bowc->bopc", mw, x)
    return x


# -----------------------------------------------------------------------------
# Glue: deterministic stand-in for the pretrained SegFormer encoder (NHWC).
# -----------------------------------------------------------------------------
def standin_encoder(x_nhwc, enc_proj):
    # TODO(synk): SegformerModel.from_pretrained('nvidia/mit-b0') encoder is not
    # reimplemented; this deterministic stand-in (strided average pool + fixed
    # channel projection) produces hidden states with the exact shapes
    # (B, H/2^(i+2), W/2^(i+2), C_i) the decode head expects.
    B, H, W, C = x_nhwc.shape
    states = []
    for i, w in enumerate(enc_proj):
        s = 2 ** (i + 2)
        pooled = x_nhwc.reshape(B, H // s, s, W // s, s, C).mean(axis=(2, 4))
        states.append(jnp.einsum("bhwc,ck->bhwk", pooled, w))
    return states


def apply_mlp(hidden_state, w, b):
    # SegformerMLP: per-pixel Linear.  Input/output are NHWC, so the reshape to
    # (P, C) rows is free (no transpose).
    B, h, w_, C = hidden_state.shape
    Ch = w.shape[1]
    rows = hidden_state.reshape(B * h * w_, C)
    y = pallas_linear(rows, w, b)
    return y.reshape(B, h, w_, Ch)


# -----------------------------------------------------------------------------
# Parameter construction (deterministic, synthetic; shapes from __init__)
# -----------------------------------------------------------------------------
def generate_embedding(key, dim):
    emb = jax.random.normal(key, (dim,), dtype=jnp.float32)
    return emb / jnp.linalg.norm(emb)


def init_params(
    key,
    image_size=32,
    hidden_sizes=(8, 16, 24, 32),     # mit-b0 real: (32, 64, 160, 256)
    decoder_hidden_size=32,           # mit-b0 real: 256
    num_classes=3,
):
    q = image_size // 4               # quarter-resolution side (80 for 320x320)
    Ch = decoder_hidden_size
    Cf = Ch * len(hidden_sizes) + 10  # linear_fuse in_channels (+10 VSA channels)

    keys = jax.random.split(key, 3 * len(hidden_sizes) + 12)
    it = iter(keys)

    enc_proj = [0.3 * jax.random.normal(next(it), (3, c), dtype=jnp.float32)
                for c in hidden_sizes]
    linear_c = [
        (
            jax.random.normal(next(it), (c, Ch), dtype=jnp.float32) / np.sqrt(c),
            0.01 * jax.random.normal(next(it), (Ch,), dtype=jnp.float32),
        )
        for c in hidden_sizes
    ]

    w_fuse = jax.random.normal(next(it), (Cf, Ch), dtype=jnp.float32) / np.sqrt(Cf)

    # Eval-mode BatchNorm2d folded into scale/shift.
    gamma = 1.0 + 0.1 * jax.random.normal(next(it), (Ch,), dtype=jnp.float32)
    beta = 0.1 * jax.random.normal(next(it), (Ch,), dtype=jnp.float32)
    run_mean = 0.1 * jax.random.normal(next(it), (Ch,), dtype=jnp.float32)
    run_var = jnp.abs(jax.random.normal(next(it), (Ch,), dtype=jnp.float32)) + 0.5
    eps = 1e-5
    bn_scale = gamma / jnp.sqrt(run_var + eps)
    bn_shift = beta - run_mean * bn_scale

    w_cls = (jax.random.normal(next(it), (Ch, num_classes), dtype=jnp.float32)
             / np.sqrt(Ch))
    b_cls = 0.01 * jax.random.normal(next(it), (num_classes,), dtype=jnp.float32)

    # VSA task embeddings: unit-norm random vector, stored NHWC (1, q, q, 10)
    # to mirror the (1, 10, q, q) NCHW parameter of the PyTorch module.
    task_emb_1 = generate_embedding(next(it), 10 * q * q).reshape(1, 10, q, q)
    task_emb_2 = generate_embedding(next(it), 10 * q * q).reshape(1, 10, q, q)
    task_emb_1 = task_emb_1.transpose(0, 2, 3, 1)
    task_emb_2 = task_emb_2.transpose(0, 2, 3, 1)

    return dict(
        enc_proj=enc_proj,
        linear_c=linear_c,
        w_fuse=w_fuse,
        bn_scale=bn_scale,
        bn_shift=bn_shift,
        w_cls=w_cls,
        b_cls=b_cls,
        task_emb_1=task_emb_1,
        task_emb_2=task_emb_2,
    )


# -----------------------------------------------------------------------------
# Forward pass (mirrors TASFormerVSAEmbedding.forward, NCHW in / NCHW out)
# -----------------------------------------------------------------------------
def tasformer_vsa_forward(params, inp, task_num):
    B, _, H, W = inp.shape

    # Single layout change at the module boundary: NCHW -> NHWC.
    x = inp.transpose(0, 2, 3, 1)

    # torchvision.transforms.Normalize
    mean = jnp.array([0.485, 0.456, 0.406], dtype=jnp.float32).reshape(1, 1, 1, 3)
    std = jnp.array([0.229, 0.224, 0.225], dtype=jnp.float32).reshape(1, 1, 1, 3)
    x = (x - mean) / std

    encoder_hidden_states = standin_encoder(x, params["enc_proj"])
    qh, qw = encoder_hidden_states[0].shape[1:3]

    all_hidden_states = []
    for hs, (w, b) in zip(encoder_hidden_states, params["linear_c"]):
        proj = apply_mlp(hs, w, b)                       # Pallas row-tiled matmul
        proj = bilinear_resize_nhwc(proj, qh, qw)        # upsample to 1/4 res
        all_hidden_states.append(proj)

    task_emb = params["task_emb_1"] if task_num == 1 else params["task_emb_2"]
    all_hidden_states.append(jnp.tile(task_emb, (B, 1, 1, 1)))

    # torch.cat(all_hidden_states[::-1], dim=1) -> channel concat (reversed).
    # Pieces are cast to bf16 before the concat (fused-head operands are bf16
    # anyway) and a trailing zero block pads the channel count to a multiple of
    # 128 inside the concat itself, so no separate (P, Cf) pad-copy is made.
    Cf = params["w_fuse"].shape[0]
    Cf_pad = _round_up(Cf, 128)
    pieces = [t.astype(jnp.bfloat16) for t in all_hidden_states[::-1]]
    if Cf_pad != Cf:
        pieces.append(jnp.zeros((B, qh, qw, Cf_pad - Cf), dtype=jnp.bfloat16))
    hidden_states = jnp.concatenate(pieces, axis=-1)

    # Fused: linear_fuse (1x1 conv, no bias) -> BatchNorm -> ReLU -> dropout
    # (identity) -> classifier (1x1 conv) as one Pallas kernel over pixel rows.
    rows = hidden_states.reshape(B * qh * qw, Cf_pad)
    logits_rows = pallas_fused_head(
        rows,
        params["w_fuse"],
        params["bn_scale"],
        params["bn_shift"],
        params["w_cls"],
        params["b_cls"],
        tm=512,
    )
    NC = params["w_cls"].shape[1]
    logits = logits_rows.reshape(B, qh, qw, NC)

    # Final bilinear upsample to the input resolution, then back to NCHW.
    logits = bilinear_resize_nhwc(logits, H, W)
    return {"out": [logits.transpose(0, 3, 1, 2)]}


if __name__ == "__main__":
    key = jax.random.PRNGKey(0)
    k_inp, k_param = jax.random.split(key)

    B, H, W, NUM_CLASSES = 2, 32, 32, 3
    inp = jax.random.uniform(k_inp, (B, 3, H, W), dtype=jnp.float32)
    params = init_params(k_param, image_size=H, num_classes=NUM_CLASSES)

    forward_jit = jax.jit(tasformer_vsa_forward, static_argnames=("task_num",))

    out = forward_jit(params, inp, task_num=1)
    logits = out["out"][0]
    jax.block_until_ready(logits)

    assert logits.shape == (B, NUM_CLASSES, H, W), logits.shape
    assert logits.dtype == jnp.float32
    assert bool(jnp.all(jnp.isfinite(logits)))

    # also exercise the task_num != 1 branch
    out2 = forward_jit(params, inp, task_num=2)
    jax.block_until_ready(out2["out"][0])

    print("KERNEL_OK")
</pallas_src>

<mosaic_0001>
module attributes {stable_mosaic.version = 11 : i64} {
  func.func @_linear_kernel(%arg0: i32, %arg1: memref<128x128xbf16, #tpu.memory_space<vmem>>, %arg2: memref<128x128xbf16, #tpu.memory_space<vmem>>, %arg3: memref<1x128xf32, #tpu.memory_space<vmem>>, %arg4: memref<128x128xf32, #tpu.memory_space<vmem>>) attributes {dimension_semantics = [#tpu.dimension_semantics<parallel>], iteration_bounds = array<i64: 1>, scalar_prefetch = 0 : i64, scratch_operands = 0 : i64, tpu.core_type = #tpu.core_type<tc>, window_params = [{transform_indices = @transform_0, window_bounds = array<i64: 128, 128>}, {pipeline_mode = #tpu.pipeline_mode<synchronous>, transform_indices = @transform_1, window_bounds = array<i64: 128, 128>}, {pipeline_mode = #tpu.pipeline_mode<synchronous>, transform_indices = @transform_2, window_bounds = array<i64: 1, 128>}, {transform_indices = @transform_3, window_bounds = array<i64: 128, 128>}]} {
    %c0 = arith.constant 0 : index
    %c0_0 = arith.constant 0 : index
    %0 = vector.load %arg1[%c0, %c0_0] : memref<128x128xbf16, #tpu.memory_space<vmem>>, vector<128x128xbf16>
    %c0_1 = arith.constant 0 : index
    %c0_2 = arith.constant 0 : index
    %1 = vector.load %arg2[%c0_1, %c0_2] : memref<128x128xbf16, #tpu.memory_space<vmem>>, vector<128x128xbf16>
    %cst = arith.constant dense<0.000000e+00> : vector<128x128xf32>
    %2 = tpu.matmul %0, %1, %cst {dimension_numbers = #tpu.dot_dimension_numbers<[1], [0], [0], [1], [0, 0, 1, 1], [], []>} : vector<128x128xbf16>, vector<128x128xbf16>, vector<128x128xf32> -> vector<128x128xf32>
    %c0_3 = arith.constant 0 : index
    %c0_4 = arith.constant 0 : index
    %3 = vector.load %arg3[%c0_3, %c0_4] : memref<1x128xf32, #tpu.memory_space<vmem>>, vector<1x128xf32>
    %4 = vector.broadcast %3 : vector<1x128xf32> to vector<128x128xf32>
    %5 = arith.addf %2, %4 : vector<128x128xf32>
    %c0_5 = arith.constant 0 : index
    %c0_6 = arith.constant 0 : index
    %6 = vector.load %arg4[%c0_5, %c0_6] : memref<128x128xf32, #tpu.memory_space<vmem>>, vector<128x128xf32>
    tpu.vector_store %arg4[%c0_5, %c0_6], %5 {strides = array<i32>} : memref<128x128xf32, #tpu.memory_space<vmem>>, vector<128x128xf32>,
    return
  }
  func.func @transform_0(%arg0: i32) -> (i32, i32) {
    %c0_i32 = arith.constant 0 : i32
    %c0_i32_0 = arith.constant 0 : i32
    return %arg0, %c0_i32 : i32, i32
  }
  func.func @transform_1(%arg0: i32) -> (i32, i32) {
    %c0_i32 = arith.constant 0 : i32
    %c0_i32_0 = arith.constant 0 : i32
    %c0_i32_1 = arith.constant 0 : i32
    return %c0_i32, %c0_i32_0 : i32, i32
  }
  func.func @transform_2(%arg0: i32) -> (i32, i32) {
    %c0_i32 = arith.constant 0 : i32
    %c0_i32_0 = arith.constant 0 : i32
    %c0_i32_1 = arith.constant 0 : i32
    return %c0_i32, %c0_i32_0 : i32, i32
  }
  func.func @transform_3(%arg0: i32) -> (i32, i32) {
    %c0_i32 = arith.constant 0 : i32
    %c0_i32_0 = arith.constant 0 : i32
    return %arg0, %c0_i32 : i32, i32
  }
}

module attributes {stable_mosaic.version = 11 : i64} {
  func.func @_linear_kernel(%arg0: i32, %arg1: memref<32x128xbf16, #tpu.memory_space<vmem>>, %arg2: memref<128x128xbf16, #tpu.memory_space<vmem>>, %arg3: memref<1x128xf32, #tpu.memory_space<vmem>>, %arg4: memref<32x128xf32, #tpu.memory_space<vmem>>) attributes {dimension_semantics = [#tpu.dimension_semantics<parallel>], iteration_bounds = array<i64: 1>, scalar_prefetch = 0 : i64, scratch_operands = 0 : i64, tpu.core_type = #tpu.core_type<tc>, window_params = [{transform_indices = @transform_0, window_bounds = array<i64: 32, 128>}, {pipeline_mode = #tpu.pipeline_mode<synchronous>, transform_indices = @transform_1, window_bounds = array<i64: 128, 128>}, {pipeline_mode = #tpu.pipeline_mode<synchronous>, transform_indices = @transform_2, window_bounds = array<i64: 1, 128>}, {transform_indices = @transform_3, window_bounds = array<i64: 32, 128>}]} {
    %c0 = arith.constant 0 : index
    %c0_0 = arith.constant 0 : index
    %0 = vector.load %arg1[%c0, %c0_0] : memref<32x128xbf16, #tpu.memory_space<vmem>>, vector<32x128xbf16>
    %c0_1 = arith.constant 0 : index
    %c0_2 = arith.constant 0 : index
    %1 = vector.load %arg2[%c0_1, %c0_2] : memref<128x128xbf16, #tpu.memory_space<vmem>>, vector<128x128xbf16>
    %cst = arith.constant dense<0.000000e+00> : vector<32x128xf32>
    %2 = tpu.matmul %0, %1, %cst {dimension_numbers = #tpu.dot_dimension_numbers<[1], [0], [0], [1], [0, 0, 1, 1], [], []>} : vector<32x128xbf16>, vector<128x128xbf16>, vector<32x128xf32> -> vector<32x128xf32>
    %c0_3 = arith.constant 0 : index
    %c0_4 = arith.constant 0 : index
    %3 = vector.load %arg3[%c0_3, %c0_4] : memref<1x128xf32, #tpu.memory_space<vmem>>, vector<1x128xf32>
    %4 = vector.broadcast %3 : vector<1x128xf32> to vector<32x128xf32>
    %5 = arith.addf %2, %4 : vector<32x128xf32>
    %c0_5 = arith.constant 0 : index
    %c0_6 = arith.constant 0 : index
    %6 = vector.load %arg4[%c0_5, %c0_6] : memref<32x128xf32, #tpu.memory_space<vmem>>, vector<32x128xf32>
    tpu.vector_store %arg4[%c0_5, %c0_6], %5 {strides = array<i32>} : memref<32x128xf32, #tpu.memory_space<vmem>>, vector<32x128xf32>,
    return
  }
  func.func @transform_0(%arg0: i32) -> (i32, i32) {
    %c0_i32 = arith.constant 0 : i32
    %c0_i32_0 = arith.constant 0 : i32
    return %arg0, %c0_i32 : i32, i32
  }
  func.func @transform_1(%arg0: i32) -> (i32, i32) {
    %c0_i32 = arith.constant 0 : i32
    %c0_i32_0 = arith.constant 0 : i32
    %c0_i32_1 = arith.constant 0 : i32
    return %c0_i32, %c0_i32_0 : i32, i32
  }
  func.func @transform_2(%arg0: i32) -> (i32, i32) {
    %c0_i32 = arith.constant 0 : i32
    %c0_i32_0 = arith.constant 0 : i32
    %c0_i32_1 = arith.constant 0 : i32
    return %c0_i32, %c0_i32_0 : i32, i32
  }
  func.func @transform_3(%arg0: i32) -> (i32, i32) {
    %c0_i32 = arith.constant 0 : i32
    %c0_i32_0 = arith.constant 0 : i32
    return %arg0, %c0_i32 : i32, i32
  }
}

module attributes {stable_mosaic.version = 11 : i64} {
  func.func @_linear_kernel(%arg0: i32, %arg1: memref<8x128xbf16, #tpu.memory_space<vmem>>, %arg2: memref<128x128xbf16, #tpu.memory_space<vmem>>, %arg3: memref<1x128xf32, #tpu.memory_space<vmem>>, %arg4: memref<8x128xf32, #tpu.memory_space<vmem>>) attributes {dimension_semantics = [#tpu.dimension_semantics<parallel>], iteration_bounds = array<i64: 1>, scalar_prefetch = 0 : i64, scratch_operands = 0 : i64, tpu.core_type = #tpu.core_type<tc>, window_params = [{transform_indices = @transform_0, window_bounds = array<i64: 8, 128>}, {pipeline_mode = #tpu.pipeline_mode<synchronous>, transform_indices = @transform_1, window_bounds = array<i64: 128, 128>}, {pipeline_mode = #tpu.pipeline_mode<synchronous>, transform_indices = @transform_2, window_bounds = array<i64: 1, 128>}, {transform_indices = @transform_3, window_bounds = array<i64: 8, 128>}]} {
    %c0 = arith.constant 0 : index
    %c0_0 = arith.constant 0 : index
    %0 = vector.load %arg1[%c0, %c0_0] : memref<8x128xbf16, #tpu.memory_space<vmem>>, vector<8x128xbf16>
    %c0_1 = arith.constant 0 : index
    %c0_2 = arith.constant 0 : index
    %1 = vector.load %arg2[%c0_1, %c0_2] : memref<128x128xbf16, #tpu.memory_space<vmem>>, vector<128x128xbf16>
    %cst = arith.constant dense<0.000000e+00> : vector<8x128xf32>
    %2 = tpu.matmul %0, %1, %cst {dimension_numbers = #tpu.dot_dimension_numbers<[1], [0], [0], [1], [0, 0, 1, 1], [], []>} : vector<8x128xbf16>, vector<128x128xbf16>, vector<8x128xf32> -> vector<8x128xf32>
    %c0_3 = arith.constant 0 : index
    %c0_4 = arith.constant 0 : index
    %3 = vector.load %arg3[%c0_3, %c0_4] : memref<1x128xf32, #tpu.memory_space<vmem>>, vector<1x128xf32>
    %4 = vector.broadcast %3 : vector<1x128xf32> to vector<8x128xf32>
    %5 = arith.addf %2, %4 : vector<8x128xf32>
    %c0_5 = arith.constant 0 : index
    %c0_6 = arith.constant 0 : index
    %6 = vector.load %arg4[%c0_5, %c0_6] : memref<8x128xf32, #tpu.memory_space<vmem>>, vector<8x128xf32>
    tpu.vector_store %arg4[%c0_5, %c0_6], %5 {strides = array<i32>} : memref<8x128xf32, #tpu.memory_space<vmem>>, vector<8x128xf32>,
    return
  }
  func.func @transform_0(%arg0: i32) -> (i32, i32) {
    %c0_i32 = arith.constant 0 : i32
    %c0_i32_0 = arith.constant 0 : i32
    return %arg0, %c0_i32 : i32, i32
  }
  func.func @transform_1(%arg0: i32) -> (i32, i32) {
    %c0_i32 = arith.constant 0 : i32
    %c0_i32_0 = arith.constant 0 : i32
    %c0_i32_1 = arith.constant 0 : i32
    return %c0_i32, %c0_i32_0 : i32, i32
  }
  func.func @transform_2(%arg0: i32) -> (i32, i32) {
    %c0_i32 = arith.constant 0 : i32
    %c0_i32_0 = arith.constant 0 : i32
    %c0_i32_1 = arith.constant 0 : i32
    return %c0_i32, %c0_i32_0 : i32, i32
  }
  func.func @transform_3(%arg0: i32) -> (i32, i32) {
    %c0_i32 = arith.constant 0 : i32
    %c0_i32_0 = arith.constant 0 : i32
    return %arg0, %c0_i32 : i32, i32
  }
}

module attributes {stable_mosaic.version = 11 : i64} {
  func.func @_fused_head_kernel(%arg0: i32, %arg1: memref<128x256xbf16, #tpu.memory_space<vmem>>, %arg2: memref<256x128xbf16, #tpu.memory_space<vmem>>, %arg3: memref<1x128xf32, #tpu.memory_space<vmem>>, %arg4: memref<1x128xf32, #tpu.memory_space<vmem>>, %arg5: memref<128x128xbf16, #tpu.memory_space<vmem>>, %arg6: memref<1x128xf32, #tpu.memory_space<vmem>>, %arg7: memref<128x128xf32, #tpu.memory_space<vmem>>) attributes {dimension_semantics = [#tpu.dimension_semantics<parallel>], iteration_bounds = array<i64: 1>, scalar_prefetch = 0 : i64, scratch_operands = 0 : i64, tpu.core_type = #tpu.core_type<tc>, window_params = [{transform_indices = @transform_0, window_bounds = array<i64: 128, 256>}, {pipeline_mode = #tpu.pipeline_mode<synchronous>, transform_indices = @transform_1, window_bounds = array<i64: 256, 128>}, {pipeline_mode = #tpu.pipeline_mode<synchronous>, transform_indices = @transform_2, window_bounds = array<i64: 1, 128>}, {pipeline_mode = #tpu.pipeline_mode<synchronous>, transform_indices = @transform_3, window_bounds = array<i64: 1, 128>}, {pipeline_mode = #tpu.pipeline_mode<synchronous>, transform_indices = @transform_4, window_bounds = array<i64: 128, 128>}, {pipeline_mode = #tpu.pipeline_mode<synchronous>, transform_indices = @transform_5, window_bounds = array<i64: 1, 128>}, {transform_indices = @transform_6, window_bounds = array<i64: 128, 128>}]} {
    %c0 = arith.constant 0 : index
    %c0_0 = arith.constant 0 : index
    %0 = vector.load %arg1[%c0, %c0_0] : memref<128x256xbf16, #tpu.memory_space<vmem>>, vector<128x256xbf16>
    %c0_1 = arith.constant 0 : index
    %c0_2 = arith.constant 0 : index
    %1 = vector.load %arg2[%c0_1, %c0_2] : memref<256x128xbf16, #tpu.memory_space<vmem>>, vector<256x128xbf16>
    %cst = arith.constant dense<0.000000e+00> : vector<128x128xf32>
    %2 = tpu.matmul %0, %1, %cst {dimension_numbers = #tpu.dot_dimension_numbers<[1], [0], [0], [1], [0, 0, 1, 1], [], []>} : vector<128x256xbf16>, vector<256x128xbf16>, vector<128x128xf32> -> vector<128x128xf32>
    %c0_3 = arith.constant 0 : index
    %c0_4 = arith.constant 0 : index
    %3 = vector.load %arg3[%c0_3, %c0_4] : memref<1x128xf32, #tpu.memory_space<vmem>>, vector<1x128xf32>
    %4 = vector.broadcast %3 : vector<1x128xf32> to vector<128x128xf32>
    %5 = arith.mulf %2, %4 : vector<128x128xf32>
    %c0_5 = arith.constant 0 : index
    %c0_6 = arith.constant 0 : index
    %6 = vector.load %arg4[%c0_5, %c0_6] : memref<1x128xf32, #tpu.memory_space<vmem>>, vector<1x128xf32>
    %7 = vector.broadcast %6 : vector<1x128xf32> to vector<128x128xf32>
    %8 = arith.addf %5, %7 : vector<128x128xf32>
    %cst_7 = arith.constant 0.000000e+00 : f32
    %9 = vector.broadcast %cst_7 : f32 to vector<128x128xf32>
    %10 = arith.maximumf %8, %9 : vector<128x128xf32>
    %11 = arith.truncf %10 : vector<128x128xf32> to vector<128x128xbf16>
    %c0_8 = arith.constant 0 : index
    %c0_9 = arith.constant 0 : index
    %12 = vector.load %arg5[%c0_8, %c0_9] : memref<128x128xbf16, #tpu.memory_space<vmem>>, vector<128x128xbf16>
    %cst_10 = arith.constant dense<0.000000e+00> : vector<128x128xf32>
    %13 = tpu.matmul %11, %12, %cst_10 {dimension_numbers = #tpu.dot_dimension_numbers<[1], [0], [0], [1], [0, 0, 1, 1], [], []>} : vector<128x128xbf16>, vector<128x128xbf16>, vector<128x128xf32> -> vector<128x128xf32>
    %c0_11 = arith.constant 0 : index
    %c0_12 = arith.constant 0 : index
    %14 = vector.load %arg6[%c0_11, %c0_12] : memref<1x128xf32, #tpu.memory_space<vmem>>, vector<1x128xf32>
    %15 = vector.broadcast %14 : vector<1x128xf32> to vector<128x128xf32>
    %16 = arith.addf %13, %15 : vector<128x128xf32>
    %c0_13 = arith.constant 0 : index
    %c0_14 = arith.constant 0 : index
    %17 = vector.load %arg7[%c0_13, %c0_14] : memref<128x128xf32, #tpu.memory_space<vmem>>, vector<128x128xf32>
    tpu.vector_store %arg7[%c0_13, %c0_14], %16 {strides = array<i32>} : memref<128x128xf32, #tpu.memory_space<vmem>>, vector<128x128xf32>,
    return
  }
  func.func @transform_0(%arg0: i32) -> (i32, i32) {
    %c0_i32 = arith.constant 0 : i32
    %c0_i32_0 = arith.constant 0 : i32
    return %arg0, %c0_i32 : i32, i32
  }
  func.func @transform_1(%arg0: i32) -> (i32, i32) {
    %c0_i32 = arith.constant 0 : i32
    %c0_i32_0 = arith.constant 0 : i32
    %c0_i32_1 = arith.constant 0 : i32
    return %c0_i32, %c0_i32_0 : i32, i32
  }
  func.func @transform_2(%arg0: i32) -> (i32, i32) {
    %c0_i32 = arith.constant 0 : i32
    %c0_i32_0 = arith.constant 0 : i32
    %c0_i32_1 = arith.constant 0 : i32
    return %c0_i32, %c0_i32_0 : i32, i32
  }
  func.func @transform_3(%arg0: i32) -> (i32, i32) {
    %c0_i32 = arith.constant 0 : i32
    %c0_i32_0 = arith.constant 0 : i32
    %c0_i32_1 = arith.constant 0 : i32
    return %c0_i32, %c0_i32_0 : i32, i32
  }
  func.func @transform_4(%arg0: i32) -> (i32, i32) {
    %c0_i32 = arith.constant 0 : i32
    %c0_i32_0 = arith.constant 0 : i32
    %c0_i32_1 = arith.constant 0 : i32
    return %c0_i32, %c0_i32_0 : i32, i32
  }
  func.func @transform_5(%arg0: i32) -> (i32, i32) {
    %c0_i32 = arith.constant 0 : i32
    %c0_i32_0 = arith.constant 0 : i32
    %c0_i32_1 = arith.constant 0 : i32
    return %c0_i32, %c0_i32_0 : i32, i32
  }
  func.func @transform_6(%arg0: i32) -> (i32, i32) {
    %c0_i32 = arith.constant 0 : i32
    %c0_i32_0 = arith.constant 0 : i32
    return %arg0, %c0_i32 : i32, i32
  }
}

</mosaic_0001>

<bundles_post_ra>
// kernel: tasformer_vsa_forward.5
= control target key start
LH: loop header
LB: loop body
LE: loop exit
PB: predicated region body
PF: predicated region fallthrough
CT: control target
= control target key end

     0   :  { %s483_s1 = inlined_call_operand.vmem [shape: bf16[128,128], index: 1, kind: input, shape index: {}]   ;;  %s484_s0 = inlined_call_operand.vmem [shape: bf16[128,128], index: 0, kind: input, shape index: {}]   ;;  %s485_s2 = inlined_call_operand.vmem [shape: f32[1,128], index: 2, kind: input, shape index: {}]   ;;  %s486_s3 = inlined_call_operand.vmem [shape: f32[128,128], index: 3, kind: output, shape index: {}]  }
   0x1   :  { %v348_v0 = vld [vmem:[%s483_s1] sm:$0xff]   ;;  %v349_v1 = vld [vmem:[%s483_s1 + $0x8] sm:$0xff]   ;;  %v350_v2 = vld [vmem:[%s483_s1 + $0x10] sm:$0xff]  }
   0x2   :  { %300 = vmatprep.subr.bf16.mxu0 %v348_v0  ;;  %332 = vmatprep.subr.bf16.mxu1 %v348_v0  ;;  %v351_v3 = vld [vmem:[%s483_s1 + $0x18] sm:$0xff]   ;;  %v356_v4 = vld [vmem:[%s484_s0] sm:$0xff]   ;;  %v353_v7 = vld [vmem:[%s483_s1 + $0x28] sm:$0xff]  }
   0x3   :  { %301 = vmatpush3.bf16.msra.mxu0 %v348_v0  ;;  %340 = vmatpush3.bf16.msra.mxu1 %v348_v0  ;;  %v357_v5 = vld [vmem:[%s484_s0 + $0x20] sm:$0xff]   ;;  %v354_v8 = vld [vmem:[%s483_s1 + $0x30] sm:$0xff]   ;;  %v355_v9 = vld [vmem:[%s483_s1 + $0x38] sm:$0xff]  }
   0x4   :  { %302 = vmatprep.subr.bf16.mxu0 %v349_v1  ;;  %333 = vmatprep.subr.bf16.mxu1 %v349_v1  ;;  %v352_v6 = vld [vmem:[%s483_s1 + $0x20] sm:$0xff]   ;;  %v358_v10 = vld [vmem:[%s484_s0 + $0x8] sm:$0xff]   ;;  %v360_v12 = vld [vmem:[%s484_s0 + $0x10] sm:$0xff]  }
   0x5   :  { %316 = vmatprep.mubr.bf16.mxu0 %v356_v4  ;;  %324 = vmatprep.mubr.bf16.mxu1 %v357_v5  ;;  %v359_v11 = vld [vmem:[%s484_s0 + $0x28] sm:$0xff]   ;;  %v361_v13 = vld [vmem:[%s484_s0 + $0x30] sm:$0xff]   ;;  %v362_v14 = vld [vmem:[%s484_s0 + $0x18] sm:$0xff]  }
   0x6   :  { %v363_v15 = vld [vmem:[%s484_s0 + $0x38] sm:$0xff]   ;;  %v267_v16 = vld [vmem:[%s485_s2] ss:$0 sm:$0xff] }
   0x7   :  { %303 = vmatpush3.bf16.msra.mxu0 %v349_v1  ;;  %341 = vmatpush3.bf16.msra.mxu1 %v349_v1 }
   0x8   :  { %304 = vmatprep.subr.bf16.mxu0 %v350_v2  ;;  %334 = vmatprep.subr.bf16.mxu1 %v350_v2 }
   0xb   :  { %305 = vmatpush3.bf16.msra.mxu0 %v350_v2  ;;  %342 = vmatpush3.bf16.msra.mxu1 %v350_v2 }
   0xc   :  { %306 = vmatprep.subr.bf16.mxu0 %v351_v3  ;;  %335 = vmatprep.subr.bf16.mxu1 %v351_v3 }
   0xf   :  { %307 = vmatpush3.bf16.msra.mxu0 %v351_v3  ;;  %343 = vmatpush3.bf16.msra.mxu1 %v351_v3 }
  0x10   :  { %308 = vmatprep.subr.bf16.mxu0 %v352_v6  ;;  %336 = vmatprep.subr.bf16.mxu1 %v352_v6 }
  0x13   :  { %309 = vmatpush3.bf16.msra.mxu0 %v352_v6  ;;  %344 = vmatpush3.bf16.msra.mxu1 %v352_v6 }
  0x14   :  { %310 = vmatprep.subr.bf16.mxu0 %v353_v7  ;;  %337 = vmatprep.subr.bf16.mxu1 %v353_v7 }
  0x17   :  { %311 = vmatpush3.bf16.msra.mxu0 %v353_v7  ;;  %345 = vmatpush3.bf16.msra.mxu1 %v353_v7 }
  0x18   :  { %312 = vmatprep.subr.bf16.mxu0 %v354_v8  ;;  %338 = vmatprep.subr.bf16.mxu1 %v354_v8 }
  0x1b   :  { %313 = vmatpush3.bf16.msra.mxu0 %v354_v8  ;;  %346 = vmatpush3.bf16.msra.mxu1 %v354_v8 }
  0x1c   :  { %314 = vmatprep.subr.bf16.mxu0 %v355_v9  ;;  %339 = vmatprep.subr.bf16.mxu1 %v355_v9 }
  0x1f   :  { %315 = vmatpush3.bf16.msra.mxu0 %v355_v9  ;;  %347 = vmatpush3.bf16.msra.mxu1 %v355_v9 }
  0x22   :  { %317 = vmatmul.mubr.bf16.vlgmr.msra.gmra.mrb[0].mxu0 %v358_v10  ;;  %325 = vmatmul.mubr.bf16.vlgmr.msra.gmra.mrb[0].mxu1 %v359_v11 }
  0x23   :  { %320 = vmatprep.mubr.bf16.mxu0 %v360_v12  ;;  %328 = vmatprep.mubr.bf16.mxu1 %v361_v13 }
  0x2a   :  { %321 = vmatmul.mubr.bf16.gmra.mrb[4].mxu0 %v362_v14  ;;  %329 = vmatmul.mubr.bf16.gmra.mrb[4].mxu1 %v363_v15 }
  0xf5   :  { %v318_v17 = vpop.f32.mrb[0].mxu0  ;;  %v326_v18 = vpop.f32.mrb[0].mxu1 }
  0xf6   :  { %v193_v19 = vadd.f32 %v318_v17, %v267_v16  ;;  %v225_v20 = vadd.f32 %v326_v18, %v267_v16  ;;  %v184_v21 = vpop.f32.mrb[1].mxu0  ;;  %v216_v22 = vpop.f32.mrb[1].mxu1 }
  0xf7   :  { %v185_v23 = vadd.f32 %v267_v16, %v184_v21  ;;  %v217_v24 = vadd.f32 %v267_v16, %v216_v22  ;;  %v319_v25 = vpop.f32.mrb[2].mxu0  ;;  %v327_v26 = vpop.f32.mrb[2].mxu1 }
  0xf8   :  { %249 = vst [vmem:[%s486_s3 + $0x10] sm:$0xff] %v193_v19  ;;  %257 = vst [vmem:[%s486_s3 + $0x50] sm:$0xff] %v225_v20  ;;  %v196_v27 = vadd.f32 %v319_v25, %v267_v16  ;;  %v228_v28 = vadd.f32 %v327_v26, %v267_v16  ;;  %v187_v29 = vpop.f32.mrb[3].mxu0  ;;  %v219_v30 = vpop.f32.mrb[3].mxu1 }
  0xf9   :  { %247 = vst [vmem:[%s486_s3] sm:$0xff] %v185_v23  ;;  %255 = vst [vmem:[%s486_s3 + $0x40] sm:$0xff] %v217_v24  ;;  %v188_v31 = vadd.f32 %v267_v16, %v187_v29  ;;  %v220_v32 = vadd.f32 %v267_v16, %v219_v30 }
  0xfa   :  { %250 = vst [vmem:[%s486_s3 + $0x18] sm:$0xff] %v196_v27  ;;  %258 = vst [vmem:[%s486_s3 + $0x58] sm:$0xff] %v228_v28 }
  0xfb   :  { %248 = vst [vmem:[%s486_s3 + $0x8] sm:$0xff] %v188_v31  ;;  %256 = vst [vmem:[%s486_s3 + $0x48] sm:$0xff] %v220_v32 }
  0xfd   :  { %v322_v33 = vpop.f32.mrb[4].mxu0  ;;  %v330_v34 = vpop.f32.mrb[4].mxu1 }
  0xfe   :  { %v209_v35 = vadd.f32 %v322_v33, %v267_v16  ;;  %v241_v36 = vadd.f32 %v330_v34, %v267_v16  ;;  %v200_v37 = vpop.f32.mrb[5].mxu0  ;;  %v232_v38 = vpop.f32.mrb[5].mxu1 }
  0xff   :  { %v201_v39 = vadd.f32 %v267_v16, %v200_v37  ;;  %v233_v40 = vadd.f32 %v267_v16, %v232_v38  ;;  %v323_v41 = vpop.f32.mrb[6].mxu0  ;;  %v331_v42 = vpop.f32.mrb[6].mxu1 }
 0x100   :  { %253 = vst [vmem:[%s486_s3 + $0x30] sm:$0xff] %v209_v35  ;;  %261 = vst [vmem:[%s486_s3 + $0x70] sm:$0xff] %v241_v36  ;;  %v212_v43 = vadd.f32 %v323_v41, %v267_v16  ;;  %v244_v44 = vadd.f32 %v331_v42, %v267_v16  ;;  %v203_v45 = vpop.f32.mrb[7].mxu0  ;;  %v235_v46 = vpop.f32.mrb[7].mxu1 }
 0x101   :  { %251 = vst [vmem:[%s486_s3 + $0x20] sm:$0xff] %v201_v39  ;;  %259 = vst [vmem:[%s486_s3 + $0x60] sm:$0xff] %v233_v40  ;;  %v204_v47 = vadd.f32 %v267_v16, %v203_v45  ;;  %v236_v48 = vadd.f32 %v267_v16, %v235_v46 }
 0x102   :  { %254 = vst [vmem:[%s486_s3 + $0x38] sm:$0xff] %v212_v43  ;;  %262 = vst [vmem:[%s486_s3 + $0x78] sm:$0xff] %v244_v44 }
 0x103   :  { %252 = vst [vmem:[%s486_s3 + $0x28] sm:$0xff] %v204_v47  ;;  %260 = vst [vmem:[%s486_s3 + $0x68] sm:$0xff] %v236_v48 }

// kernel: tasformer_vsa_forward.6
= control target key start
LH: loop header
LB: loop body
LE: loop exit
PB: predicated region body
PF: predicated region fallthrough
CT: control target
= control target key end

     0   :  { %s275_s1 = inlined_call_operand.vmem [shape: bf16[128,128], index: 1, kind: input, shape index: {}]   ;;  %s276_s0 = inlined_call_operand.vmem [shape: bf16[32,128], index: 0, kind: input, shape index: {}]   ;;  %s277_s2 = inlined_call_operand.vmem [shape: f32[1,128], index: 2, kind: input, shape index: {}]   ;;  %s278_s3 = inlined_call_operand.vmem [shape: f32[32,128], index: 3, kind: output, shape index: {}]  }
   0x1   :  { %v200_v0 = vld [vmem:[%s275_s1] sm:$0xff]   ;;  %v201_v1 = vld [vmem:[%s275_s1 + $0x8] sm:$0xff]   ;;  %v202_v2 = vld [vmem:[%s275_s1 + $0x10] sm:$0xff]  }
   0x2   :  { %180 = vmatprep.subr.bf16.mxu0 %v200_v0  ;;  %v203_v3 = vld [vmem:[%s275_s1 + $0x18] sm:$0xff]   ;;  %v208_v4 = vld [vmem:[%s276_s0] sm:$0xff]   ;;  %v205_v6 = vld [vmem:[%s275_s1 + $0x28] sm:$0xff]  }
   0x3   :  { %181 = vmatpush3.bf16.msra.mxu0 %v200_v0  ;;  %196 = vmatprep.mubr.bf16.mxu0 %v208_v4  ;;  %v204_v5 = vld [vmem:[%s275_s1 + $0x20] sm:$0xff]   ;;  %v206_v7 = vld [vmem:[%s275_s1 + $0x30] sm:$0xff]   ;;  %v207_v8 = vld [vmem:[%s275_s1 + $0x38] sm:$0xff]  }
   0x4   :  { %182 = vmatprep.subr.bf16.mxu0 %v201_v1  ;;  %v209_v9 = vld [vmem:[%s276_s0 + $0x8] sm:$0xff]   ;;  %v159_v10 = vld [vmem:[%s277_s2] ss:$0 sm:$0xff] }
   0x7   :  { %183 = vmatpush3.bf16.msra.mxu0 %v201_v1 }
   0x8   :  { %184 = vmatprep.subr.bf16.mxu0 %v202_v2 }
   0xb   :  { %185 = vmatpush3.bf16.msra.mxu0 %v202_v2 }
   0xc   :  { %186 = vmatprep.subr.bf16.mxu0 %v203_v3 }
   0xf   :  { %187 = vmatpush3.bf16.msra.mxu0 %v203_v3 }
  0x10   :  { %188 = vmatprep.subr.bf16.mxu0 %v204_v5 }
  0x13   :  { %189 = vmatpush3.bf16.msra.mxu0 %v204_v5 }
  0x14   :  { %190 = vmatprep.subr.bf16.mxu0 %v205_v6 }
  0x17   :  { %191 = vmatpush3.bf16.msra.mxu0 %v205_v6 }
  0x18   :  { %192 = vmatprep.subr.bf16.mxu0 %v206_v7 }
  0x1b   :  { %193 = vmatpush3.bf16.msra.mxu0 %v206_v7 }
  0x1c   :  { %194 = vmatprep.subr.bf16.mxu0 %v207_v8 }
  0x1f   :  { %195 = vmatpush3.bf16.msra.mxu0 %v207_v8 }
  0x22   :  { %197 = vmatmul.mubr.bf16.vlgmr.msra.gmra.mrb[0].mxu0 %v209_v9 }
  0xf5   :  { %v198_v11 = vpop.f32.mrb[0].mxu0 }
  0xf6   :  { %v145_v12 = vadd.f32 %v198_v11, %v159_v10  ;;  %v136_v13 = vpop.f32.mrb[1].mxu0 }
  0xf7   :  { %v137_v14 = vadd.f32 %v159_v10, %v136_v13  ;;  %v199_v15 = vpop.f32.mrb[2].mxu0 }
  0xf8   :  { %153 = vst [vmem:[%s278_s3 + $0x10] sm:$0xff] %v145_v12  ;;  %v148_v16 = vadd.f32 %v199_v15, %v159_v10  ;;  %v139_v17 = vpop.f32.mrb[3].mxu0 }
  0xf9   :  { %151 = vst [vmem:[%s278_s3] sm:$0xff] %v137_v14  ;;  %v140_v18 = vadd.f32 %v159_v10, %v139_v17 }
  0xfa   :  { %154 = vst [vmem:[%s278_s3 + $0x18] sm:$0xff] %v148_v16 }
  0xfb   :  { %152 = vst [vmem:[%s278_s3 + $0x8] sm:$0xff] %v140_v18 }

// kernel: tasformer_vsa_forward.7
= control target key start
LH: loop header
LB: loop body
LE: loop exit
PB: predicated region body
PF: predicated region fallthrough
CT: control target
= control target key end

     0   :  { %v180_v0 = vmov 0.0   ;;  %vm181_vm0 = vmmov 0   ;;  %s235_s1 = inlined_call_operand.vmem [shape: bf16[128,128], index: 1, kind: input, shape index: {}]   ;;  %s236_s0 = inlined_call_operand.vmem [shape: bf16[8,128], index: 0, kind: input, shape index: {}]   ;;  %s237_s2 = inlined_call_operand.vmem [shape: f32[1,128], index: 2, kind: input, shape index: {}]   ;;  %s238_s3 = inlined_call_operand.vmem [shape: f32[8,128], index: 3, kind: output, shape index: {}]  }
   0x1   :  { %150 = vmatprep.subr.bf16.mxu0 %v180_v0  ;;  %v172_v1 = vld [vmem:[%s235_s1] sm:$0xff]   ;;  %166 = vmatprep.mubr.msk.bf16.mxu0 %vm181_vm0, %v180_v0  ;;  %v173_v2 = vld [vmem:[%s235_s1 + $0x8] sm:$0xff]   ;;  %v174_v3 = vld [vmem:[%s235_s1 + $0x10] sm:$0xff]  }
   0x2   :  { %151 = vmatpush3.bf16.msra.mxu0 %v172_v1  ;;  %v175_v4 = vld [vmem:[%s235_s1 + $0x18] sm:$0xff]   ;;  %v176_v5 = vld [vmem:[%s235_s1 + $0x20] sm:$0xff]   ;;  %v177_v6 = vld [vmem:[%s235_s1 + $0x28] sm:$0xff]  }
   0x3   :  { %152 = vmatprep.subr.bf16.mxu0 %v180_v0  ;;  %v178_v7 = vld [vmem:[%s235_s1 + $0x30] sm:$0xff]   ;;  %v179_v8 = vld [vmem:[%s235_s1 + $0x38] sm:$0xff]   ;;  %v15_v9 = vld [vmem:[%s236_s0] sm:$0xf] }
   0x4   :  { %v132_v10 = vld [vmem:[%s237_s2] ss:$0 sm:$0xff] }
   0x6   :  { %153 = vmatpush3.bf16.msra.mxu0 %v173_v2 }
   0x7   :  { %154 = vmatprep.subr.bf16.mxu0 %v180_v0 }
   0xa   :  { %155 = vmatpush3.bf16.msra.mxu0 %v174_v3 }
   0xb   :  { %156 = vmatprep.subr.bf16.mxu0 %v180_v0 }
   0xe   :  { %157 = vmatpush3.bf16.msra.mxu0 %v175_v4 }
   0xf   :  { %158 = vmatprep.subr.bf16.mxu0 %v180_v0 }
  0x12   :  { %159 = vmatpush3.bf16.msra.mxu0 %v176_v5 }
  0x13   :  { %160 = vmatprep.subr.bf16.mxu0 %v180_v0 }
  0x16   :  { %161 = vmatpush3.bf16.msra.mxu0 %v177_v6 }
  0x17   :  { %162 = vmatprep.subr.bf16.mxu0 %v180_v0 }
  0x1a   :  { %163 = vmatpush3.bf16.msra.mxu0 %v178_v7 }
  0x1b   :  { %164 = vmatprep.subr.bf16.mxu0 %v180_v0 }
  0x1e   :  { %165 = vmatpush3.bf16.msra.mxu0 %v179_v8 }
  0x21   :  { %167 = vmatmul.mubr.bf16.vlgmr.msra.gmra.mrb[0].mxu0 %v15_v9 }
  0xf4   :  { %v121_v11 = vpop.f32.mrb[0].mxu0 }
  0xf5   :  { %v122_v12 = vadd.f32 %v132_v10, %v121_v11  ;;  %v168_v13 = vpop.f32.mrb[1].mxu0 }
  0xf6   :  { %v124_v14 = vpop.f32.mrb[2].mxu0 }
  0xf7   :  { %127 = vst [vmem:[%s238_s3] sm:$0xff] %v122_v12  ;;  %v169_v15 = vpop.f32.mrb[3].mxu0 }

// kernel: tasformer_vsa_forward.9
= control target key start
LH: loop header
LB: loop body
LE: loop exit
PB: predicated region body
PF: predicated region fallthrough
CT: control target
= control target key end

     0   :  { %s1054_s1 = inlined_call_operand.vmem [shape: bf16[256,128], index: 1, kind: input, shape index: {}]   ;;  %s1055_s0 = inlined_call_operand.vmem [shape: bf16[128,256], index: 0, kind: input, shape index: {}]   ;;  %s1056_s4 = inlined_call_operand.vmem [shape: bf16[128,128], index: 4, kind: input, shape index: {}]   ;;  %s1057_s2 = inlined_call_operand.vmem [shape: f32[1,128], index: 2, kind: input, shape index: {}]   ;;  %s1058_s3 = inlined_call_operand.vmem [shape: f32[1,128], index: 3, kind: input, shape index: {}]   ;;  %s1059_s5 = inlined_call_operand.vmem [shape: f32[1,128], index: 5, kind: input, shape index: {}]   ;;  %s1060_s6 = inlined_call_operand.vmem [shape: f32[128,128], index: 6, kind: output, shape index: {}]  }
   0x1   :  { %v758_v0 = vld [vmem:[%s1054_s1 + $0x40] sm:$0xff]   ;;  %v760_v2 = vld [vmem:[%s1054_s1 + $0x48] sm:$0xff]   ;;  %v762_v4 = vld [vmem:[%s1054_s1 + $0x50] sm:$0xff]  }
   0x2   :  { %v759_v1 = vld [vmem:[%s1054_s1] sm:$0xff]   ;;  %646 = vmatprep.subr.bf16.mxu0 %v758_v0  ;;  %v761_v3 = vld [vmem:[%s1054_s1 + $0x8] sm:$0xff]   ;;  %v763_v5 = vld [vmem:[%s1054_s1 + $0x10] sm:$0xff]  }
   0x3   :  { %647 = vmatpush3.bf16.msra.mxu0 %v759_v1  ;;  %v764_v6 = vld [vmem:[%s1054_s1 + $0x58] sm:$0xff]   ;;  %v766_v8 = vld [vmem:[%s1054_s1 + $0x60] sm:$0xff]   ;;  %v768_v10 = vld [vmem:[%s1054_s1 + $0x68] sm:$0xff]  }
   0x4   :  { %648 = vmatprep.subr.bf16.mxu0 %v760_v2  ;;  %v765_v7 = vld [vmem:[%s1054_s1 + $0x18] sm:$0xff]   ;;  %v767_v9 = vld [vmem:[%s1054_s1 + $0x20] sm:$0xff]   ;;  %v769_v12 = vld [vmem:[%s1054_s1 + $0x28] sm:$0xff]  }
   0x5   :  { %v776_v11 = vld [vmem:[%s1055_s0 + $0x4] ss:$8 sps:$4 sm:$0xff]   ;;  %v770_v13 = vld [vmem:[%s1054_s1 + $0x70] sm:$0xff]   ;;  %v772_v15 = vld [vmem:[%s1054_s1 + $0x78] sm:$0xff]  }
   0x6   :  { %280 = vmatprep.mubr.bf16.mxu0 %v776_v11  ;;  %v771_v14 = vld [vmem:[%s1054_s1 + $0x30] sm:$0xff]   ;;  %v773_v16 = vld [vmem:[%s1054_s1 + $0x38] sm:$0xff]   ;;  %v798_v17 = vld [vmem:[%s1056_s4] sm:$0xff]  }
   0x7   :  { %649 = vmatpush3.bf16.msra.mxu0 %v761_v3  ;;  %v774_v18 = vld [vmem:[%s1055_s0] ss:$8 sps:$4 sm:$0xff]   ;;  %v777_v20 = vld [vmem:[%s1055_s0 + $0x14] ss:$8 sps:$4 sm:$0xff]   ;;  %726 = vmatprep.subr.bf16.mxu1 %v798_v17  ;;  %v779_v22 = vld [vmem:[%s1055_s0 + $0x10] ss:$8 sps:$4 sm:$0xff]  }
   0x8   :  { %650 = vmatprep.subr.bf16.mxu0 %v762_v4  ;;  %v799_v19 = vld [vmem:[%s1056_s4 + $0x8] sm:$0xff]   ;;  %v800_v21 = vld [vmem:[%s1056_s4 + $0x10] sm:$0xff]   ;;  %727 = vmatpush3.bf16.msra.mxu1 %v798_v17  ;;  %v801_v35 = vld [vmem:[%s1056_s4 + $0x18] sm:$0xff]  }
   0x9   :  { %728 = vmatprep.subr.bf16.mxu1 %v799_v19  ;;  %v780_v23 = vld [vmem:[%s1055_s0 + $0x24] ss:$8 sps:$4 sm:$0xff]   ;;  %v782_v24 = vld [vmem:[%s1055_s0 + $0x20] ss:$8 sps:$4 sm:$0xff]   ;;  %v783_v25 = vld [vmem:[%s1055_s0 + $0x34] ss:$8 sps:$4 sm:$0xff]  }
   0xa   :  { %v785_v26 = vld [vmem:[%s1055_s0 + $0x30] ss:$8 sps:$4 sm:$0xff]   ;;  %v786_v27 = vld [vmem:[%s1055_s0 + $0x44] ss:$8 sps:$4 sm:$0xff]   ;;  %v788_v28 = vld [vmem:[%s1055_s0 + $0x40] ss:$8 sps:$4 sm:$0xff]  }
   0xb   :  { %651 = vmatpush3.bf16.msra.mxu0 %v763_v5  ;;  %v789_v29 = vld [vmem:[%s1055_s0 + $0x54] ss:$8 sps:$4 sm:$0xff]   ;;  %v791_v30 = vld [vmem:[%s1055_s0 + $0x50] ss:$8 sps:$4 sm:$0xff]   ;;  %v792_v31 = vld [vmem:[%s1055_s0 + $0x64] ss:$8 sps:$4 sm:$0xff]  }
   0xc   :  { %652 = vmatprep.subr.bf16.mxu0 %v764_v6  ;;  %729 = vmatpush3.bf16.msra.mxu1 %v799_v19  ;;  %v794_v32 = vld [vmem:[%s1055_s0 + $0x60] ss:$8 sps:$4 sm:$0xff]   ;;  %v795_v33 = vld [vmem:[%s1055_s0 + $0x74] ss:$8 sps:$4 sm:$0xff]   ;;  %v797_v34 = vld [vmem:[%s1055_s0 + $0x70] ss:$8 sps:$4 sm:$0xff]  }
   0xd   :  { %730 = vmatprep.subr.bf16.mxu1 %v800_v21  ;;  %v802_v36 = vld [vmem:[%s1056_s4 + $0x20] sm:$0xff]   ;;  %v803_v37 = vld [vmem:[%s1056_s4 + $0x28] sm:$0xff]   ;;  %v804_v38 = vld [vmem:[%s1056_s4 + $0x30] sm:$0xff]  }
   0xe   :  { %v805_v39 = vld [vmem:[%s1056_s4 + $0x38] sm:$0xff]   ;;  %v964_v42 = vld [vmem:[%s1057_s2] ss:$0 sm:$0xff] }
   0xf   :  { %653 = vmatpush3.bf16.msra.mxu0 %v765_v7  ;;  %v969_v46 = vld [vmem:[%s1058_s3] ss:$0 sm:$0xff] }
  0x10   :  { %654 = vmatprep.subr.bf16.mxu0 %v766_v8  ;;  %731 = vmatpush3.bf16.msra.mxu1 %v800_v21 }
  0x11   :  { %732 = vmatprep.subr.bf16.mxu1 %v801_v35 }
  0x13   :  { %655 = vmatpush3.bf16.msra.mxu0 %v767_v9 }
  0x14   :  { %656 = vmatprep.subr.bf16.mxu0 %v768_v10  ;;  %733 = vmatpush3.bf16.msra.mxu1 %v801_v35 }
  0x15   :  { %734 = vmatprep.subr.bf16.mxu1 %v802_v36 }
  0x17   :  { %657 = vmatpush3.bf16.msra.mxu0 %v769_v12 }
  0x18   :  { %658 = vmatprep.subr.bf16.mxu0 %v770_v13  ;;  %735 = vmatpush3.bf16.msra.mxu1 %v802_v36 }
  0x19   :  { %736 = vmatprep.subr.bf16.mxu1 %v803_v37 }
  0x1b   :  { %659 = vmatpush3.bf16.msra.mxu0 %v771_v14 }
  0x1c   :  { %660 = vmatprep.subr.bf16.mxu0 %v772_v15  ;;  %737 = vmatpush3.bf16.msra.mxu1 %v803_v37 }
  0x1d   :  { %738 = vmatprep.subr.bf16.mxu1 %v804_v38 }
  0x1f   :  { %661 = vmatpush3.bf16.msra.mxu0 %v773_v16 }
  0x20   :  { %739 = vmatpush3.bf16.msra.mxu1 %v804_v38 }
  0x21   :  { %740 = vmatprep.subr.bf16.mxu1 %v805_v39 }
  0x22   :  { %281 = vmatmul.mubr.bf16.vlgmr.msra.gmra.mrb[0].mxu0 %v774_v18 }
  0x23   :  { %288 = vmatprep.mubr.bf16.mxu0 %v777_v20 }
  0x24   :  { %741 = vmatpush3.bf16.msra.mxu1 %v805_v39 }
  0x2a   :  { %289 = vmatmul.mubr.bf16.gmra.mrb[4].mxu0 %v779_v22 }
  0x2b   :  { %296 = vmatprep.mubr.bf16.mxu0 %v780_v23 }
  0x32   :  { %297 = vmatmul.mubr.bf16.gmra.mrb[8].mxu0 %v782_v24 }
  0x33   :  { %304 = vmatprep.mubr.bf16.mxu0 %v783_v25 }
  0x3a   :  { %305 = vmatmul.mubr.bf16.gmra.mrb[12].mxu0 %v785_v26 }
  0x3b   :  { %312 = vmatprep.mubr.bf16.mxu0 %v786_v27 }
  0x42   :  { %313 = vmatmul.mubr.bf16.gmra.mrb[16].mxu0 %v788_v28 }
  0x43   :  { %320 = vmatprep.mubr.bf16.mxu0 %v789_v29 }
  0x4a   :  { %321 = vmatmul.mubr.bf16.gmra.mrb[20].mxu0 %v791_v30 }
  0x4b   :  { %328 = vmatprep.mubr.bf16.mxu0 %v792_v31 }
  0x52   :  { %329 = vmatmul.mubr.bf16.gmra.mrb[24].mxu0 %v794_v32 }
  0x53   :  { %336 = vmatprep.mubr.bf16.mxu0 %v795_v33 }
  0x5a   :  { %337 = vmatmul.mubr.bf16.gmra.mrb[28].mxu0 %v797_v34 }
  0xf5   :  { %v662_v40 = vpop.f32.mrb[0].mxu0 }
  0xf6   :  { %v663_v41 = vpop.f32.mrb[1].mxu0 }
  0xf7   :  { %v664_v43 = vadd.f32 %v663_v41, %v662_v40  ;;  %v665_v44 = vpop.f32.mrb[2].mxu0 }
  0xf8   :  { %v666_v45 = vpop.f32.mrb[3].mxu0 }
  0xf9   :  { %v352_v47 = vmul.f32 %v664_v43, %v964_v42  ;;  %v667_v48 = vadd.f32 %v666_v45, %v665_v44 }
  0xfb   :  { %v353_v49 = vmul.f32 %v667_v48, %v964_v42  ;;  %v375_v50 = vadd.f32 %v969_v46, %v352_v47 }
  0xfd   :  { %v668_v51 = vpop.f32.mrb[4].mxu0  ;;  %v376_v52 = vadd.f32 %v969_v46, %v353_v49  ;;  %v391_v56 = vmax.f32 %v375_v50, 0.0 }
  0xfe   :  { %v669_v53 = vpop.f32.mrb[5].mxu0 }
  0xff   :  { %v670_v54 = vadd.f32 %v669_v53, %v668_v51  ;;  %v671_v55 = vpop.f32.mrb[6].mxu0  ;;  %v392_v57 = vmax.f32 %v376_v52, 0.0 }
 0x100   :  { %v672_v58 = vpop.f32.mrb[7].mxu0 }
 0x101   :  { %v354_v59 = vmul.f32 %v670_v54, %v964_v42  ;;  %v673_v60 = vadd.f32 %v672_v58, %v671_v55  ;;  %v407_v61 = vpack.c.bf16 %v392_v57, %v391_v56 }
 0x103   :  { %v377_v62 = vadd.f32 %v969_v46, %v354_v59  ;;  %v355_v63 = vmul.f32 %v673_v60, %v964_v42  ;;  %742 = vmatprep.mubr.bf16.mxu1 %v407_v61 }
 0x105   :  { %v378_v0 = vadd.f32 %v969_v46, %v355_v63  ;;  %v674_v1 = vpop.f32.mrb[8].mxu0  ;;  %v393_v3 = vmax.f32 %v377_v62, 0.0 }
 0x106   :  { %v675_v2 = vpop.f32.mrb[9].mxu0 }
 0x107   :  { %v394_v4 = vmax.f32 %v378_v0, 0.0  ;;  %v676_v5 = vadd.f32 %v675_v2, %v674_v1  ;;  %v677_v6 = vpop.f32.mrb[10].mxu0 }
 0x108   :  { %v678_v7 = vpop.f32.mrb[11].mxu0 }
 0x109   :  { %v356_v8 = vmul.f32 %v676_v5, %v964_v42  ;;  %v679_v9 = vadd.f32 %v678_v7, %v677_v6  ;;  %v408_v10 = vpack.c.bf16 %v394_v4, %v393_v3 }
 0x10b   :  { %v379_v11 = vadd.f32 %v969_v46, %v356_v8  ;;  %v357_v12 = vmul.f32 %v679_v9, %v964_v42  ;;  %743 = vmatmul.mubr.bf16.vlgmr.msra.gmra.mrb[0].mxu1 %v408_v10 }
 0x10d   :  { %v380_v13 = vadd.f32 %v969_v46, %v357_v12  ;;  %v680_v14 = vpop.f32.mrb[12].mxu0  ;;  %v395_v16 = vmax.f32 %v379_v11, 0.0 }
 0x10e   :  { %v681_v15 = vpop.f32.mrb[13].mxu0 }
 0x10f   :  { %v396_v17 = vmax.f32 %v380_v13, 0.0  ;;  %v682_v18 = vadd.f32 %v681_v15, %v680_v14  ;;  %v683_v19 = vpop.f32.mrb[14].mxu0 }
 0x110   :  { %v684_v20 = vpop.f32.mrb[15].mxu0 }
 0x111   :  { %v358_v21 = vmul.f32 %v682_v18, %v964_v42  ;;  %v685_v22 = vadd.f32 %v684_v20, %v683_v19  ;;  %v409_v23 = vpack.c.bf16 %v396_v17, %v395_v16  ;;  %v637_v20 = vld [vmem:[%s1059_s5] ss:$0 sm:$0xff] }
 0x113   :  { %v381_v24 = vadd.f32 %v969_v46, %v358_v21  ;;  %v359_v25 = vmul.f32 %v685_v22, %v964_v42  ;;  %746 = vmatprep.mubr.bf16.mxu1 %v409_v23 }
 0x115   :  { %v382_v26 = vadd.f32 %v969_v46, %v359_v25  ;;  %v686_v27 = vpop.f32.mrb[16].mxu0  ;;  %v397_v29 = vmax.f32 %v381_v24, 0.0 }
 0x116   :  { %v687_v28 = vpop.f32.mrb[17].mxu0 }
 0x117   :  { %v398_v30 = vmax.f32 %v382_v26, 0.0  ;;  %v688_v31 = vadd.f32 %v687_v28, %v686_v27  ;;  %v689_v32 = vpop.f32.mrb[18].mxu0 }
 0x118   :  { %v690_v33 = vpop.f32.mrb[19].mxu0 }
 0x119   :  { %v360_v34 = vmul.f32 %v688_v31, %v964_v42  ;;  %v691_v35 = vadd.f32 %v690_v33, %v689_v32  ;;  %v410_v36 = vpack.c.bf16 %v398_v30, %v397_v29 }
 0x11b   :  { %v383_v37 = vadd.f32 %v969_v46, %v360_v34  ;;  %v361_v38 = vmul.f32 %v691_v35, %v964_v42  ;;  %747 = vmatmul.mubr.bf16.gmra.mrb[4].mxu1 %v410_v36 }
 0x11d   :  { %v384_v39 = vadd.f32 %v969_v46, %v361_v38  ;;  %v692_v40 = vpop.f32.mrb[20].mxu0  ;;  %v399_v43 = vmax.f32 %v383_v37, 0.0 }
 0x11e   :  { %v693_v41 = vpop.f32.mrb[21].mxu0 }
 0x11f   :  { %v400_v44 = vmax.f32 %v384_v39, 0.0  ;;  %v694_v45 = vadd.f32 %v693_v41, %v692_v40  ;;  %v695_v47 = vpop.f32.mrb[22].mxu0 }
 0x120   :  { %v696_v48 = vpop.f32.mrb[23].mxu0 }
 0x121   :  { %v362_v49 = vmul.f32 %v694_v45, %v964_v42  ;;  %v697_v50 = vadd.f32 %v696_v48, %v695_v47  ;;  %v411_v51 = vpack.c.bf16 %v400_v44, %v399_v43 }
 0x123   :  { %v385_v52 = vadd.f32 %v969_v46, %v362_v49  ;;  %v363_v53 = vmul.f32 %v697_v50, %v964_v42  ;;  %750 = vmatprep.mubr.bf16.mxu1 %v411_v51 }
 0x125   :  { %v386_v54 = vadd.f32 %v969_v46, %v363_v53  ;;  %v698_v55 = vpop.f32.mrb[24].mxu0  ;;  %v401_v57 = vmax.f32 %v385_v52, 0.0 }
 0x126   :  { %v699_v56 = vpop.f32.mrb[25].mxu0 }
 0x127   :  { %v402_v58 = vmax.f32 %v386_v54, 0.0  ;;  %v700_v59 = vadd.f32 %v699_v56, %v698_v55  ;;  %v701_v60 = vpop.f32.mrb[26].mxu0 }
 0x128   :  { %v702_v61 = vpop.f32.mrb[27].mxu0 }
 0x129   :  { %v364_v62 = vmul.f32 %v700_v59, %v964_v42  ;;  %v703_v63 = vadd.f32 %v702_v61, %v701_v60  ;;  %v412_v0 = vpack.c.bf16 %v402_v58, %v401_v57 }
 0x12b   :  { %v387_v1 = vadd.f32 %v969_v46, %v364_v62  ;;  %v365_v2 = vmul.f32 %v703_v63, %v964_v42  ;;  %751 = vmatmul.mubr.bf16.gmra.mrb[8].mxu1 %v412_v0 }
 0x12d   :  { %v388_v3 = vadd.f32 %v969_v46, %v365_v2  ;;  %v704_v4 = vpop.f32.mrb[28].mxu0  ;;  %v403_v6 = vmax.f32 %v387_v1, 0.0 }
 0x12e   :  { %v705_v5 = vpop.f32.mrb[29].mxu0 }
 0x12f   :  { %v404_v7 = vmax.f32 %v388_v3, 0.0  ;;  %v706_v8 = vadd.f32 %v705_v5, %v704_v4  ;;  %v707_v9 = vpop.f32.mrb[30].mxu0 }
 0x130   :  { %v708_v10 = vpop.f32.mrb[31].mxu0 }
 0x131   :  { %v366_v11 = vmul.f32 %v706_v8, %v964_v42  ;;  %v709_v12 = vadd.f32 %v708_v10, %v707_v9  ;;  %v413_v13 = vpack.c.bf16 %v404_v7, %v403_v6 }
 0x133   :  { %v389_v14 = vadd.f32 %v969_v46, %v366_v11  ;;  %v367_v15 = vmul.f32 %v709_v12, %v964_v42  ;;  %754 = vmatprep.mubr.bf16.mxu1 %v413_v13 }
 0x135   :  { %v390_v16 = vadd.f32 %v969_v46, %v367_v15  ;;  %v405_v17 = vmax.f32 %v389_v14, 0.0 }
 0x137   :  { %v406_v18 = vmax.f32 %v390_v16, 0.0 }
 0x139   :  { %v414_v19 = vpack.c.bf16 %v406_v18, %v405_v17 }
 0x13b   :  { %755 = vmatmul.mubr.bf16.gmra.mrb[12].mxu1 %v414_v19 }
 0x1de   :  { %v744_v21 = vpop.f32.mrb[0].mxu1 }
 0x1df   :  { %v529_v22 = vadd.f32 %v744_v21, %v637_v20  ;;  %v520_v23 = vpop.f32.mrb[1].mxu1 }
 0x1e0   :  { %v521_v24 = vadd.f32 %v637_v20, %v520_v23  ;;  %v745_v25 = vpop.f32.mrb[2].mxu1 }
 0x1e1   :  { %585 = vst [vmem:[%s1060_s6 + $0x10] sm:$0xff] %v529_v22  ;;  %v532_v42 = vadd.f32 %v745_v25, %v637_v20  ;;  %v523_v26 = vpop.f32.mrb[3].mxu1 }
 0x1e2   :  { %583 = vst [vmem:[%s1060_s6] sm:$0xff] %v521_v24  ;;  %v524_v46 = vadd.f32 %v637_v20, %v523_v26 }
 0x1e3   :  { %586 = vst [vmem:[%s1060_s6 + $0x18] sm:$0xff] %v532_v42 }
 0x1e4   :  { %584 = vst [vmem:[%s1060_s6 + $0x8] sm:$0xff] %v524_v46 }
 0x1ee   :  { %v748_v27 = vpop.f32.mrb[4].mxu1 }
 0x1ef   :  { %v545_v28 = vadd.f32 %v748_v27, %v637_v20  ;;  %v536_v29 = vpop.f32.mrb[5].mxu1 }
 0x1f0   :  { %v537_v30 = vadd.f32 %v637_v20, %v536_v29  ;;  %v749_v31 = vpop.f32.mrb[6].mxu1 }
 0x1f1   :  { %589 = vst [vmem:[%s1060_s6 + $0x30] sm:$0xff] %v545_v28  ;;  %v548_v32 = vadd.f32 %v749_v31, %v637_v20  ;;  %v539_v33 = vpop.f32.mrb[7].mxu1 }
 0x1f2   :  { %587 = vst [vmem:[%s1060_s6 + $0x20] sm:$0xff] %v537_v30  ;;  %v540_v34 = vadd.f32 %v637_v20, %v539_v33 }
 0x1f3   :  { %590 = vst [vmem:[%s1060_s6 + $0x38] sm:$0xff] %v548_v32 }
 0x1f4   :  { %588 = vst [vmem:[%s1060_s6 + $0x28] sm:$0xff] %v540_v34 }
 0x1fe   :  { %v752_v35 = vpop.f32.mrb[8].mxu1 }
 0x1ff   :  { %v561_v36 = vadd.f32 %v752_v35, %v637_v20  ;;  %v552_v37 = vpop.f32.mrb[9].mxu1 }
 0x200   :  { %v553_v38 = vadd.f32 %v637_v20, %v552_v37  ;;  %v753_v39 = vpop.f32.mrb[10].mxu1 }
 0x201   :  { %593 = vst [vmem:[%s1060_s6 + $0x50] sm:$0xff] %v561_v36  ;;  %v564_v40 = vadd.f32 %v753_v39, %v637_v20  ;;  %v555_v41 = vpop.f32.mrb[11].mxu1 }
 0x202   :  { %591 = vst [vmem:[%s1060_s6 + $0x40] sm:$0xff] %v553_v38  ;;  %v556_v43 = vadd.f32 %v637_v20, %v555_v41 }
 0x203   :  { %594 = vst [vmem:[%s1060_s6 + $0x58] sm:$0xff] %v564_v40 }
 0x204   :  { %592 = vst [vmem:[%s1060_s6 + $0x48] sm:$0xff] %v556_v43 }
 0x20e   :  { %v756_v44 = vpop.f32.mrb[12].mxu1 }
 0x20f   :  { %v577_v45 = vadd.f32 %v756_v44, %v637_v20  ;;  %v568_v47 = vpop.f32.mrb[13].mxu1 }
 0x210   :  { %v569_v48 = vadd.f32 %v637_v20, %v568_v47  ;;  %v757_v49 = vpop.f32.mrb[14].mxu1 }
 0x211   :  { %597 = vst [vmem:[%s1060_s6 + $0x70] sm:$0xff] %v577_v45  ;;  %v580_v50 = vadd.f32 %v757_v49, %v637_v20  ;;  %v571_v51 = vpop.f32.mrb[15].mxu1 }
 0x212   :  { %595 = vst [vmem:[%s1060_s6 + $0x60] sm:$0xff] %v569_v48  ;;  %v572_v52 = vadd.f32 %v637_v20, %v571_v51 }
 0x213   :  { %598 = vst [vmem:[%s1060_s6 + $0x78] sm:$0xff] %v580_v50 }
 0x214   :  { %596 = vst [vmem:[%s1060_s6 + $0x68] sm:$0xff] %v572_v52 }

</bundles_post_ra>
